<compile_context>
chip_gen: v7x
topology: tpu7x:2x2x1
jax: 0.10.0
libtpu: 0.0.40
codegen_flags: <defaults>
</compile_context>

<pallas_src>
import jax
import jax.numpy as jnp
from jax.experimental import pallas as pl
from jax.experimental.pallas import tpu as pltpu  # noqa: F401  (TPU backend import)

_LANE = 128          # TPU lane width
_TILE_ROWS = 512     # 512 rows x 128 lanes x 4 B = 256 KiB f32 per block


def _identity_copy_kernel(p_ref, o_ref):
    # Pure elementwise passthrough: o = p (one vld + one vst per block).
    o_ref[...] = p_ref[...]


def channel_out_forward(params_out: jax.Array, *, use_pallas: bool = True) -> dict:
    """Reproduces ChannelOut.forward(): returns {'out': params_out}.

    params_out: (1, c_out, 1, 1, 1) parameter.

    use_pallas=False is the zero-cost path recommended by the perf review
    (pure passthrough, no kernel launch).  use_pallas=True runs a minimal,
    input/output-aliased identity-copy Pallas kernel.
    """
    assert params_out.ndim == 5
    if not use_pallas:
        # Highest-value optimization: no kernel at all.
        return {'out': params_out}

    c_out = params_out.shape[1]
    dtype = params_out.dtype

    if c_out % _LANE == 0:
        # Lane-dense view: (rows, 128) so stores are unmasked full-lane vst.
        rows = c_out // _LANE
        flat = params_out.reshape(rows, _LANE)
        tile_rows = rows if rows <= _TILE_ROWS else _TILE_ROWS
        if rows % tile_rows != 0:
            tile_rows = rows  # ragged: single full-array block (still lane-dense)

        out_flat = pl.pallas_call(
            _identity_copy_kernel,
            out_shape=jax.ShapeDtypeStruct((rows, _LANE), dtype),
            grid=(rows // tile_rows,),
            in_specs=[pl.BlockSpec((tile_rows, _LANE), lambda i: (i, 0))],
            out_specs=pl.BlockSpec((tile_rows, _LANE), lambda i: (i, 0)),
            # Alias output onto the parameter buffer: no extra HBM alloc or
            # writeback when the input is donated; kernel is launch-cost only.
            input_output_aliases={0: 0},
        )(flat)
    else:
        # Small / ragged C: single full-array block (block dims == array dims,
        # so the (8,128) divisibility constraint does not apply).
        flat = params_out.reshape(1, c_out)
        out_flat = pl.pallas_call(
            _identity_copy_kernel,
            out_shape=jax.ShapeDtypeStruct((1, c_out), dtype),
            in_specs=[pl.BlockSpec((1, c_out), lambda: (0, 0))],
            out_specs=pl.BlockSpec((1, c_out), lambda: (0, 0)),
            input_output_aliases={0: 0},
        )(flat)

    return {'out': out_flat.reshape(params_out.shape)}


def init_channel_out_params(conv_dimension):
    """Matches nn.Parameter(torch.zeros(1, c_out, 1, 1, 1))."""
    _c_in, c_out = conv_dimension
    return jnp.zeros((1, c_out, 1, 1, 1), dtype=jnp.float32)


if __name__ == "__main__":
    # --- Case 1: module semantics (conv_dimension=(4, 8), zero-init param) ---
    conv_dimension = (4, 8)
    params_out = init_channel_out_params(conv_dimension)

    result = channel_out_forward(params_out, use_pallas=True)
    out = jax.block_until_ready(result['out'])
    assert out.shape == (1, conv_dimension[1], 1, 1, 1)
    assert out.dtype == jnp.float32
    assert bool(jnp.all(out == 0.0))

    # Zero-cost recommended path gives the identical answer.
    result_fast = channel_out_forward(params_out, use_pallas=False)
    assert bool(jnp.all(jax.block_until_ready(result_fast['out']) == out))

    # --- Case 2: lane-dense path (c_out multiple of 128), random param ------
    key = jax.random.PRNGKey(0)
    c_out_big = 256
    params_rand = jax.random.normal(key, (1, c_out_big, 1, 1, 1), dtype=jnp.float32)
    out_big = jax.block_until_ready(channel_out_forward(params_rand)['out'])
    assert out_big.shape == (1, c_out_big, 1, 1, 1)
    assert bool(jnp.all(out_big == params_rand))

    print("KERNEL_OK")
</pallas_src>

<mosaic_0001>
module attributes {stable_mosaic.version = 11 : i64} {
  func.func @_identity_copy_kernel(%arg0: memref<1x8xf32, #tpu.memory_space<vmem>>, %arg1: memref<1x8xf32, #tpu.memory_space<vmem>>) attributes {dimension_semantics = [], scalar_prefetch = 0 : i64, scratch_operands = 0 : i64, tpu.core_type = #tpu.core_type<tc>} {
    %c0 = arith.constant 0 : index
    %c0_0 = arith.constant 0 : index
    %0 = vector.load %arg0[%c0, %c0_0] : memref<1x8xf32, #tpu.memory_space<vmem>>, vector<1x8xf32>
    %c0_1 = arith.constant 0 : index
    %c0_2 = arith.constant 0 : index
    %1 = vector.load %arg1[%c0_1, %c0_2] : memref<1x8xf32, #tpu.memory_space<vmem>>, vector<1x8xf32>
    tpu.vector_store %arg1[%c0_1, %c0_2], %0 {strides = array<i32>} : memref<1x8xf32, #tpu.memory_space<vmem>>, vector<1x8xf32>,
    return
  }
}

</mosaic_0001>

<bundles_post_ra>
// kernel: tpu_custom_call.1
= control target key start
LH: loop header
LB: loop body
LE: loop exit
PB: predicated region body
PF: predicated region fallthrough
CT: control target
= control target key end

     0   :  { %6 = vsyncpa [#allocation3], 0  ;;  %s125_s0 = inlined_call_operand.hbm [shape: f32[1,8], index: 0, kind: input, shape index: {}, may-alias: {0,1}]   ;;  %s126_s1 = inlined_call_operand.hbm [shape: f32[1,8], index: 1, kind: output, shape index: {}, may-alias: {0,1}]  }
   0x1   :  { %7 = vsyncpa [#allocation4], 0  ;;  %s89_s6 = smov [#allocation2]   ;;  %s41_s10 = scalar_lea.hbm %s125_s0, 16 }
   0x2   :  { %s14_s7 = sshll.u32 %s89_s6, 4  ;;  %p42_p0 = scmp.ne.s32.totalorder %s125_s0, %s41_s10  ;;  %s15_s7 = int_to_ptr.vmem [resolvable:$true] %s14_s7 }
   0x3   :  { %p45_p1 = scmp.lt.u32.totalorder %s41_s10, %s125_s0 }
   0x5   :  { %p47_p2 = pnand %p45_p1, %p42_p0 }
   0x7   :  { %50 = shalt.err (!%p47_p2)
}
   0x8   :  { %s51_s15 = scalar_lea.vmem %s15_s7, 16  ;;  %s55_s16 = scalar_lea.vmem %s15_s7, 32 }
   0x9   :  { %p52_p3 = scmp.ne.s32.totalorder %s15_s7, %s51_s15  ;;  %p56_p4 = scmp.lt.s32.totalorder %s15_s7, %s15_s7 }
   0xa   :  { %p57_p5 = scmp.lt.s32.totalorder %s55_s16, %s51_s15 }
   0xc   :  { %p58_p6 = por %p57_p5, %p56_p4 }
   0xe   :  { %p59_p7 = pnand %p58_p6, %p52_p3 }
  0x10   :  { %62 = shalt.err (!%p59_p7)
}
  0x11   :  { %17 = dma.hbm_to_vmem [thread:$0]  %s125_s0, 16, %s15_s7, [#allocation3]  }
  0x12   :  { %85 = dma.done.wait [#allocation3], 16  }
  0x13   :  { %86 = vsyncadd [#allocation3], 4294967280  ;;  %s90_s19 = smov [#allocation5]   ;;  %vm22_vm0 = vcmask 57344   ;;  %v21_v0 = vld [vmem:[#allocation2] sm:$0x1] }
  0x14   :  { %s30_s20 = sshll.u32 %s90_s19, 4  ;;  %23 = vst.msk [vmem:[#allocation5] sm:$0x1] %vm22_vm0, %v21_v0  ;;  %s31_s20 = int_to_ptr.vmem [resolvable:$true] %s30_s20 }
  0x15   :  { %s63_s21 = scalar_lea.vmem %s31_s20, 16  ;;  %s67_s22 = scalar_lea.vmem %s31_s20, 32 }
  0x16   :  { %p64_p8 = scmp.ne.s32.totalorder %s31_s20, %s63_s21  ;;  %p68_p9 = scmp.lt.s32.totalorder %s31_s20, %s31_s20 }
  0x17   :  { %p69_p10 = scmp.lt.s32.totalorder %s67_s22, %s63_s21 }
  0x19   :  { %p70_p11 = por %p69_p10, %p68_p9 }
  0x1b   :  { %p71_p12 = pnand %p70_p11, %p64_p8 }
  0x1d   :  { %74 = shalt.err (!%p71_p12)
}
  0x1e   :  { %s75_s0 = scalar_lea.hbm %s126_s1, 16 }
  0x1f   :  { %p76_p13 = scmp.ne.s32.totalorder %s126_s1, %s75_s0  ;;  %p79_p0 = scmp.lt.u32.totalorder %s75_s0, %s126_s1 }
  0x21   :  { %p81_p1 = pnand %p79_p0, %p76_p13 }
  0x23   :  { %84 = shalt.err (!%p81_p1)
}
  0x24   :  { %33 = dma.vmem_to_hbm [thread:$0]  %s31_s20, 16, %s126_s1, [#allocation4]  }
  0x25   :  { %87 = dma.done.wait [#allocation4], 16  }
  0x26   :  { %88 = vsyncadd [#allocation4], 4294967280 }
  0x27   :  { %37 = vsyncpa [#allocation3], 1 }
  0x28   :  { %38 = vsyncpa [#allocation4], 1 }

</bundles_post_ra>
